<compile_context>
chip_gen: v6e
topology: v6e:2x2x1
jax: 0.10.0
libtpu: 0.0.40
codegen_flags: <defaults>
</compile_context>

<pallas_src>
import numpy as np
import jax
import jax.numpy as jnp
from jax.experimental import pallas as pl
from jax.experimental.pallas import tpu as pltpu

WM_FEATURE_DIM = 8
FULL_FEATURE_DIM = WM_FEATURE_DIM + 1   # 9
HIDDEN_DIM = 32
SORT_K = 16                              # sort_k - 8 = 8 -> lin1 in = 32*8 = 256
CONV_K = 5
FUSED_GCN_MAX_NODES = 1024               # above this, use the tiled GCN path


# --------------------------- GCN: fused small-N path ------------------------

def gcn3_fused_kernel(a_ref, x_ref, w1_ref, b1_ref, w2_ref, b2_ref,
                      w3_ref, b3_ref, o_ref):
    """Three fused GCN layers: h <- relu(Ahat @ (h @ W) + b), x3.

    Ahat is the pre-normalized bf16 adjacency (built once in glue); all matmul
    operands are bf16 with f32 accumulation, biases are added in f32.
    """
    a = a_ref[...]                               # (N, N) bf16
    h = x_ref[...]                               # (N, C_in) bf16
    for w_ref, b_ref in ((w1_ref, b1_ref), (w2_ref, b2_ref), (w3_ref, b3_ref)):
        z = jnp.dot(h, w_ref[...],
                    preferred_element_type=jnp.float32).astype(jnp.bfloat16)
        y = jnp.dot(a, z, preferred_element_type=jnp.float32) + b_ref[...]
        h = jnp.maximum(y, 0.0).astype(jnp.bfloat16)
    o_ref[...] = h                               # bf16 writeback (half the bytes)


def gcn3_fused(a_hat, x, w1, b1, w2, b2, w3, b3):
    n = a_hat.shape[0]
    args = (a_hat, x, w1, b1, w2, b2, w3, b3)
    in_specs = [pl.BlockSpec(arr.shape, lambda i, nd=arr.ndim: (0,) * nd)
                for arr in args]
    return pl.pallas_call(
        gcn3_fused_kernel,
        out_shape=jax.ShapeDtypeStruct((n, HIDDEN_DIM), jnp.bfloat16),
        grid=(1,),
        in_specs=in_specs,
        out_specs=pl.BlockSpec((n, HIDDEN_DIM), lambda i: (0, 0)),
        compiler_params=pltpu.CompilerParams(
            dimension_semantics=("arbitrary",)),
    )(*args)


# --------------------------- GCN: tiled large-N path ------------------------

def gcn_layer_tiled_kernel(a_ref, x_ref, w_ref, b_ref, o_ref, acc_ref):
    # grid = (rows, K); K is the last (innermost, "arbitrary") axis.
    k = pl.program_id(1)

    @pl.when(k == 0)
    def _():
        acc_ref[...] = jnp.zeros_like(acc_ref)

    # Z = X_k @ W recomputed per row block: negligible (C_in/tm extra MXU work)
    # and the A @ Z stream is HBM-bandwidth bound anyway.
    z = jnp.dot(x_ref[...], w_ref[...],
                preferred_element_type=jnp.float32).astype(jnp.bfloat16)
    acc_ref[...] += jnp.dot(a_ref[...], z, preferred_element_type=jnp.float32)

    # Epilogue-only store (v5e has a single vst slot; keep it out of the loop).
    @pl.when(k == pl.num_programs(1) - 1)
    def _():
        o_ref[...] = jnp.maximum(acc_ref[...] + b_ref[...], 0.0).astype(o_ref.dtype)


def gcn_layer_tiled(a_hat, x, w, b, tm, tk):
    n = a_hat.shape[0]
    c_in = x.shape[1]
    c_out = w.shape[1]
    grid = (n // tm, n // tk)
    return pl.pallas_call(
        gcn_layer_tiled_kernel,
        out_shape=jax.ShapeDtypeStruct((n, c_out), jnp.bfloat16),
        grid=grid,
        in_specs=[
            pl.BlockSpec((tm, tk), lambda i, k: (i, k)),       # Ahat bf16 stream
            pl.BlockSpec((tk, c_in), lambda i, k: (k, 0)),     # X rows for this k
            pl.BlockSpec((c_in, c_out), lambda i, k: (0, 0)),  # W (resident)
            pl.BlockSpec((1, c_out), lambda i, k: (0, 0)),     # bias (f32)
        ],
        out_specs=pl.BlockSpec((tm, c_out), lambda i, k: (i, 0)),
        scratch_shapes=[pltpu.VMEM((tm, c_out), jnp.float32)],
        compiler_params=pltpu.CompilerParams(
            dimension_semantics=("parallel", "arbitrary")),
    )(a_hat, x, w, b)


def gcn3_tiled(a_hat, x, gcn_weights, tm=256, tk=512):
    """Three GCN layers, each a tiled pallas_call.  Pads N up to a tile multiple
    (zero rows/cols of Ahat contribute nothing; padded output rows are sliced
    off)."""
    n = a_hat.shape[0]
    lcm = int(np.lcm(tm, tk))
    n_pad = int(-(-n // lcm) * lcm)
    if n_pad != n:
        a_hat = jnp.pad(a_hat, ((0, n_pad - n), (0, n_pad - n)))
        x = jnp.pad(x, ((0, n_pad - n), (0, 0)))
    h = x
    for w, b in gcn_weights:
        h = gcn_layer_tiled(a_hat, h, w, b, tm, tk)
    return h[:n]


# ---------------------------------- head -------------------------------------

def head_kernel(p_ref, w1_ref, b1_ref, w2_ref, b2_ref,
                wl1_ref, bl1_ref, wl2_ref, bl2_ref, o_ref):
    # ONE grid step for the whole batch.  p_ref: (B*K, H) bf16 sort-pooled
    # features, rows grouped per graph.  All weights are bf16 (pre-cast in
    # init); biases f32 added in the f32 accumulator.
    B = o_ref.shape[0]
    K = SORT_K
    kk = CONV_K
    t1 = K - (kk - 1)
    t2 = t1 - (kk - 1)
    c1 = w1_ref.shape[2]      # 16
    c2 = w2_ref.shape[2]      # 32

    x = p_ref[...]                                              # (B*K, H) bf16

    # Conv1d #1: accumulate over taps; batch graphs via sublane-axis concat
    # (no 160-lane im2col rows, no per-graph grid steps).
    acc1 = jnp.zeros((B * t1, c1), jnp.float32)
    for k in range(kk):
        xs = jnp.concatenate(
            [x[b * K + k: b * K + k + t1, :] for b in range(B)], axis=0)
        acc1 = acc1 + jnp.dot(xs, w1_ref[k], preferred_element_type=jnp.float32)
    y1 = jnp.maximum(acc1 + b1_ref[...], 0.0).astype(jnp.bfloat16)   # (B*t1, 16)

    # Conv1d #2
    acc2 = jnp.zeros((B * t2, c2), jnp.float32)
    for k in range(kk):
        ys = jnp.concatenate(
            [y1[b * t1 + k: b * t1 + k + t2, :] for b in range(B)], axis=0)
        acc2 = acc2 + jnp.dot(ys, w2_ref[k], preferred_element_type=jnp.float32)
    y2 = jnp.maximum(acc2 + b2_ref[...], 0.0).astype(jnp.bfloat16)   # (B*t2, 32)

    # Flatten-free Linear(32*t2 -> 128): h[b] = sum_t y2[b, t, :] @ WL1[t]
    # (WL1 rows were re-ordered in init so this matches PyTorch's channel-major
    # view(b, c*t) flatten).
    h = jnp.zeros((B, 128), jnp.float32)
    for t in range(t2):
        rows = jnp.concatenate(
            [y2[b * t2 + t: b * t2 + t + 1, :] for b in range(B)], axis=0)  # (B, 32)
        h = h + jnp.dot(rows, wl1_ref[t], preferred_element_type=jnp.float32)
    h = jnp.maximum(h + bl1_ref[...], 0.0).astype(jnp.bfloat16)     # (B, 128)

    # Linear(128 -> 1): single (B, 1) writeback.
    o_ref[...] = (jnp.dot(h, wl2_ref[...], preferred_element_type=jnp.float32)
                  + bl2_ref[...])


def head(pooled2d, num_graphs, w1, b1, w2, b2, wl1, bl1, wl2, bl2):
    args = (pooled2d, w1, b1, w2, b2, wl1, bl1, wl2, bl2)
    in_specs = [pl.BlockSpec(arr.shape, lambda i, nd=arr.ndim: (0,) * nd)
                for arr in args]
    out = pl.pallas_call(
        head_kernel,
        out_shape=jax.ShapeDtypeStruct((num_graphs, 1), jnp.float32),
        grid=(1,),
        in_specs=in_specs,
        out_specs=pl.BlockSpec((num_graphs, 1), lambda i: (0, 0)),
        compiler_params=pltpu.CompilerParams(
            dimension_semantics=("arbitrary",)),
    )(*args)
    return out[:, 0]                                             # (B,)


# ------------------------------- JAX glue ----------------------------------

def build_norm_adj(edge_index, num_nodes):
    # Ahat = D^-1/2 (A + I) D^-1/2, shipped to the kernels as bf16 (same HBM
    # footprint as bf16 A; tiny bf16 rounding on normalized entries).
    # TODO(synk): for large N, use segment_sum degrees + sparse SpMM instead of
    # the dense scatter/dense Ahat.
    src, dst = edge_index[0], edge_index[1]
    a = jnp.zeros((num_nodes, num_nodes), jnp.float32)
    a = a.at[dst, src].set(1.0)
    a = a + jnp.eye(num_nodes, dtype=jnp.float32)
    deg = jnp.sum(a, axis=1)
    d_inv = 1.0 / jnp.sqrt(jnp.maximum(deg, 1.0))
    a_hat = (d_inv[:, None] * a) * d_inv[None, :]
    return a_hat.astype(jnp.bfloat16)


def global_sort_pool(x, batch, num_graphs, sort_k):
    # Vectorized: one masked top_k over all graphs + one gather.
    # TODO(synk): ragged per-graph sort/pool stays in plain JAX (no Pallas sort).
    graph_ids = jnp.arange(num_graphs, dtype=batch.dtype)
    mask = batch[None, :] == graph_ids[:, None]                  # (B, N)
    keys = jnp.where(mask, x[:, -1].astype(jnp.float32)[None, :], -jnp.inf)
    _, idx = jax.lax.top_k(keys, sort_k)                         # (B, sort_k)
    pooled = x[idx]                                              # (B, sort_k, H)
    counts = jnp.sum(mask, axis=1)                               # (B,)
    valid = jnp.arange(sort_k)[None, :] < counts[:, None]        # (B, sort_k)
    return jnp.where(valid[:, :, None], pooled, 0.0)             # bf16


def init_params(key):
    ks = jax.random.split(key, 14)
    f32, bf16 = jnp.float32, jnp.bfloat16

    def w(k, fan_in, shape):
        return jax.random.normal(k, shape, f32) / np.sqrt(fan_in)

    t2 = SORT_K - 2 * (CONV_K - 1)          # sort_k - 8
    lin1_in = HIDDEN_DIM * t2

    p = {}
    # GCNConv weights: PyTorch stores (out, in); keep (in, out) for x @ W, bf16.
    p["w_g1"] = w(ks[0], FULL_FEATURE_DIM, (FULL_FEATURE_DIM, HIDDEN_DIM)).astype(bf16)
    p["b_g1"] = 0.01 * jax.random.normal(ks[1], (1, HIDDEN_DIM), f32)
    p["w_g2"] = w(ks[2], HIDDEN_DIM, (HIDDEN_DIM, HIDDEN_DIM)).astype(bf16)
    p["b_g2"] = 0.01 * jax.random.normal(ks[3], (1, HIDDEN_DIM), f32)
    p["w_g3"] = w(ks[4], HIDDEN_DIM, (HIDDEN_DIM, HIDDEN_DIM)).astype(bf16)
    p["b_g3"] = 0.01 * jax.random.normal(ks[5], (1, HIDDEN_DIM), f32)

    # Conv1d: PyTorch (out, in, K) -> per-tap layout (K, in, out) for the
    # accumulate-over-tap convolutions.
    w_c1_pt = w(ks[6], HIDDEN_DIM * CONV_K, (16, HIDDEN_DIM, CONV_K))
    p["w_c1"] = jnp.transpose(w_c1_pt, (2, 1, 0)).astype(bf16)   # (K, 32, 16)
    p["b_c1"] = 0.01 * jax.random.normal(ks[7], (1, 16), f32)
    w_c2_pt = w(ks[8], 16 * CONV_K, (32, 16, CONV_K))
    p["w_c2"] = jnp.transpose(w_c2_pt, (2, 1, 0)).astype(bf16)   # (K, 16, 32)
    p["b_c2"] = 0.01 * jax.random.normal(ks[9], (1, 32), f32)

    # Linear 1: PyTorch weight (128, 32*t2); PyTorch flattens channel-major
    # (index c*t2 + t).  Store per-time-tap: wl1[t, c, :] = W_pt[:, c*t2 + t].
    w_l1_pt = w(ks[10], lin1_in, (128, lin1_in))
    w_l1 = w_l1_pt.T.reshape(HIDDEN_DIM, t2, 128)                # [c, t, out]
    p["w_l1"] = jnp.transpose(w_l1, (1, 0, 2)).astype(bf16)      # (t2, 32, 128)
    p["b_l1"] = (0.01 * jax.random.normal(ks[11], (128,), f32)).reshape(1, 128)

    # Linear 2: PyTorch weight (1, 128) -> (128, 1)
    p["w_l2"] = w(ks[12], 128, (1, 128)).T.astype(bf16)          # (128, 1)
    p["b_l2"] = (0.01 * jax.random.normal(ks[13], (1,), f32)).reshape(1, 1)
    return p


def dgcnn_forward(params, x, edge_index, batch, num_graphs,
                  force_tiled=False, gcn_tiles=(256, 512)):
    n = x.shape[0]
    a_hat = build_norm_adj(edge_index, n)                        # (N, N) bf16
    x_bf = x.astype(jnp.bfloat16)
    gcn_w = [(params["w_g1"], params["b_g1"]),
             (params["w_g2"], params["b_g2"]),
             (params["w_g3"], params["b_g3"])]
    if force_tiled or n > FUSED_GCN_MAX_NODES:
        h = gcn3_tiled(a_hat, x_bf, gcn_w, *gcn_tiles)           # (N, 32) bf16
    else:
        h = gcn3_fused(a_hat, x_bf,
                       params["w_g1"], params["b_g1"],
                       params["w_g2"], params["b_g2"],
                       params["w_g3"], params["b_g3"])           # (N, 32) bf16
    pooled = global_sort_pool(h, batch, num_graphs, SORT_K)      # (B, K, 32) bf16
    pooled2d = pooled.reshape(num_graphs * SORT_K, HIDDEN_DIM)   # (B*K, 32)
    return head(pooled2d, num_graphs,
                params["w_c1"], params["b_c1"],
                params["w_c2"], params["b_c2"],
                params["w_l1"], params["b_l1"],
                params["w_l2"], params["b_l2"])                  # (B,)


# --------------------------------- main -------------------------------------

if __name__ == "__main__":
    key = jax.random.PRNGKey(0)
    kx, kp = jax.random.split(key)

    sizes = [14, 10]                      # two small graphs, 24 nodes total
    num_graphs = len(sizes)
    n_nodes = sum(sizes)

    x = jax.random.normal(kx, (n_nodes, FULL_FEATURE_DIM), jnp.float32)
    batch = jnp.concatenate(
        [jnp.full((s,), i, jnp.int32) for i, s in enumerate(sizes)])

    # undirected ring within each graph
    src, dst = [], []
    off = 0
    for s in sizes:
        for i in range(s):
            j = (i + 1) % s
            src += [off + i, off + j]
            dst += [off + j, off + i]
        off += s
    edge_index = jnp.array([src, dst], jnp.int32)

    params = init_params(kp)

    # Default (fused small-N GCN) path.
    out = dgcnn_forward(params, x, edge_index, batch, num_graphs)
    out = jax.block_until_ready(out)
    assert out.shape == (num_graphs,) and out.dtype == jnp.float32

    # Also exercise the tiled (large-N) GCN path with small 8/128-aligned tiles
    # and check it agrees with the fused path (bf16-level tolerance).
    out_tiled = dgcnn_forward(params, x, edge_index, batch, num_graphs,
                              force_tiled=True, gcn_tiles=(64, 128))
    out_tiled = jax.block_until_ready(out_tiled)
    np.testing.assert_allclose(np.asarray(out), np.asarray(out_tiled),
                               rtol=5e-2, atol=5e-2)

    print("KERNEL_OK")
</pallas_src>

<mosaic_0001>
module attributes {stable_mosaic.version = 11 : i64} {
  func.func @gcn3_fused_kernel(%arg0: i32, %arg1: memref<24x24xbf16, #tpu.memory_space<vmem>>, %arg2: memref<24x9xbf16, #tpu.memory_space<vmem>>, %arg3: memref<9x32xbf16, #tpu.memory_space<vmem>>, %arg4: memref<1x32xf32, #tpu.memory_space<vmem>>, %arg5: memref<32x32xbf16, #tpu.memory_space<vmem>>, %arg6: memref<1x32xf32, #tpu.memory_space<vmem>>, %arg7: memref<32x32xbf16, #tpu.memory_space<vmem>>, %arg8: memref<1x32xf32, #tpu.memory_space<vmem>>, %arg9: memref<24x32xbf16, #tpu.memory_space<vmem>>) attributes {dimension_semantics = [#tpu.dimension_semantics<arbitrary>], iteration_bounds = array<i64: 1>, scalar_prefetch = 0 : i64, scratch_operands = 0 : i64, tpu.core_type = #tpu.core_type<tc>, window_params = [{pipeline_mode = #tpu.pipeline_mode<synchronous>, transform_indices = @transform_0, window_bounds = array<i64: 24, 24>}, {pipeline_mode = #tpu.pipeline_mode<synchronous>, transform_indices = @transform_1, window_bounds = array<i64: 24, 9>}, {pipeline_mode = #tpu.pipeline_mode<synchronous>, transform_indices = @transform_2, window_bounds = array<i64: 9, 32>}, {pipeline_mode = #tpu.pipeline_mode<synchronous>, transform_indices = @transform_3, window_bounds = array<i64: 1, 32>}, {pipeline_mode = #tpu.pipeline_mode<synchronous>, transform_indices = @transform_4, window_bounds = array<i64: 32, 32>}, {pipeline_mode = #tpu.pipeline_mode<synchronous>, transform_indices = @transform_5, window_bounds = array<i64: 1, 32>}, {pipeline_mode = #tpu.pipeline_mode<synchronous>, transform_indices = @transform_6, window_bounds = array<i64: 32, 32>}, {pipeline_mode = #tpu.pipeline_mode<synchronous>, transform_indices = @transform_7, window_bounds = array<i64: 1, 32>}, {pipeline_mode = #tpu.pipeline_mode<synchronous>, transform_indices = @transform_8, window_bounds = array<i64: 24, 32>}]} {
    %c0 = arith.constant 0 : index
    %c0_0 = arith.constant 0 : index
    %0 = vector.load %arg1[%c0, %c0_0] : memref<24x24xbf16, #tpu.memory_space<vmem>>, vector<24x24xbf16>
    %c0_1 = arith.constant 0 : index
    %c0_2 = arith.constant 0 : index
    %1 = vector.load %arg2[%c0_1, %c0_2] : memref<24x9xbf16, #tpu.memory_space<vmem>>, vector<24x9xbf16>
    %c0_3 = arith.constant 0 : index
    %c0_4 = arith.constant 0 : index
    %2 = vector.load %arg3[%c0_3, %c0_4] : memref<9x32xbf16, #tpu.memory_space<vmem>>, vector<9x32xbf16>
    %cst = arith.constant dense<0.000000e+00> : vector<24x32xf32>
    %3 = tpu.matmul %1, %2, %cst {dimension_numbers = #tpu.dot_dimension_numbers<[1], [0], [0], [1], [0, 0, 1, 1], [], []>} : vector<24x9xbf16>, vector<9x32xbf16>, vector<24x32xf32> -> vector<24x32xf32>
    %4 = arith.truncf %3 : vector<24x32xf32> to vector<24x32xbf16>
    %cst_5 = arith.constant dense<0.000000e+00> : vector<24x32xf32>
    %5 = tpu.matmul %0, %4, %cst_5 {dimension_numbers = #tpu.dot_dimension_numbers<[1], [0], [0], [1], [0, 0, 1, 1], [], []>} : vector<24x24xbf16>, vector<24x32xbf16>, vector<24x32xf32> -> vector<24x32xf32>
    %c0_6 = arith.constant 0 : index
    %c0_7 = arith.constant 0 : index
    %6 = vector.load %arg4[%c0_6, %c0_7] : memref<1x32xf32, #tpu.memory_space<vmem>>, vector<1x32xf32>
    %7 = vector.broadcast %6 : vector<1x32xf32> to vector<24x32xf32>
    %8 = arith.addf %5, %7 : vector<24x32xf32>
    %cst_8 = arith.constant 0.000000e+00 : f32
    %9 = vector.broadcast %cst_8 : f32 to vector<24x32xf32>
    %10 = arith.maximumf %8, %9 : vector<24x32xf32>
    %11 = arith.truncf %10 : vector<24x32xf32> to vector<24x32xbf16>
    %c0_9 = arith.constant 0 : index
    %c0_10 = arith.constant 0 : index
    %12 = vector.load %arg5[%c0_9, %c0_10] : memref<32x32xbf16, #tpu.memory_space<vmem>>, vector<32x32xbf16>
    %cst_11 = arith.constant dense<0.000000e+00> : vector<24x32xf32>
    %13 = tpu.matmul %11, %12, %cst_11 {dimension_numbers = #tpu.dot_dimension_numbers<[1], [0], [0], [1], [0, 0, 1, 1], [], []>} : vector<24x32xbf16>, vector<32x32xbf16>, vector<24x32xf32> -> vector<24x32xf32>
    %14 = arith.truncf %13 : vector<24x32xf32> to vector<24x32xbf16>
    %cst_12 = arith.constant dense<0.000000e+00> : vector<24x32xf32>
    %15 = tpu.matmul %0, %14, %cst_12 {dimension_numbers = #tpu.dot_dimension_numbers<[1], [0], [0], [1], [0, 0, 1, 1], [], []>} : vector<24x24xbf16>, vector<24x32xbf16>, vector<24x32xf32> -> vector<24x32xf32>
    %c0_13 = arith.constant 0 : index
    %c0_14 = arith.constant 0 : index
    %16 = vector.load %arg6[%c0_13, %c0_14] : memref<1x32xf32, #tpu.memory_space<vmem>>, vector<1x32xf32>
    %17 = vector.broadcast %16 : vector<1x32xf32> to vector<24x32xf32>
    %18 = arith.addf %15, %17 : vector<24x32xf32>
    %cst_15 = arith.constant 0.000000e+00 : f32
    %19 = vector.broadcast %cst_15 : f32 to vector<24x32xf32>
    %20 = arith.maximumf %18, %19 : vector<24x32xf32>
    %21 = arith.truncf %20 : vector<24x32xf32> to vector<24x32xbf16>
    %c0_16 = arith.constant 0 : index
    %c0_17 = arith.constant 0 : index
    %22 = vector.load %arg7[%c0_16, %c0_17] : memref<32x32xbf16, #tpu.memory_space<vmem>>, vector<32x32xbf16>
    %cst_18 = arith.constant dense<0.000000e+00> : vector<24x32xf32>
    %23 = tpu.matmul %21, %22, %cst_18 {dimension_numbers = #tpu.dot_dimension_numbers<[1], [0], [0], [1], [0, 0, 1, 1], [], []>} : vector<24x32xbf16>, vector<32x32xbf16>, vector<24x32xf32> -> vector<24x32xf32>
    %24 = arith.truncf %23 : vector<24x32xf32> to vector<24x32xbf16>
    %cst_19 = arith.constant dense<0.000000e+00> : vector<24x32xf32>
    %25 = tpu.matmul %0, %24, %cst_19 {dimension_numbers = #tpu.dot_dimension_numbers<[1], [0], [0], [1], [0, 0, 1, 1], [], []>} : vector<24x24xbf16>, vector<24x32xbf16>, vector<24x32xf32> -> vector<24x32xf32>
    %c0_20 = arith.constant 0 : index
    %c0_21 = arith.constant 0 : index
    %26 = vector.load %arg8[%c0_20, %c0_21] : memref<1x32xf32, #tpu.memory_space<vmem>>, vector<1x32xf32>
    %27 = vector.broadcast %26 : vector<1x32xf32> to vector<24x32xf32>
    %28 = arith.addf %25, %27 : vector<24x32xf32>
    %cst_22 = arith.constant 0.000000e+00 : f32
    %29 = vector.broadcast %cst_22 : f32 to vector<24x32xf32>
    %30 = arith.maximumf %28, %29 : vector<24x32xf32>
    %31 = arith.truncf %30 : vector<24x32xf32> to vector<24x32xbf16>
    %c0_23 = arith.constant 0 : index
    %c0_24 = arith.constant 0 : index
    %32 = vector.load %arg9[%c0_23, %c0_24] : memref<24x32xbf16, #tpu.memory_space<vmem>>, vector<24x32xbf16>
    tpu.vector_store %arg9[%c0_23, %c0_24], %31 {strides = array<i32>} : memref<24x32xbf16, #tpu.memory_space<vmem>>, vector<24x32xbf16>,
    return
  }
  func.func @transform_0(%arg0: i32) -> (i32, i32) {
    %c0_i32 = arith.constant 0 : i32
    %c0_i32_0 = arith.constant 0 : i32
    %c0_i32_1 = arith.constant 0 : i32
    return %c0_i32, %c0_i32_0 : i32, i32
  }
  func.func @transform_1(%arg0: i32) -> (i32, i32) {
    %c0_i32 = arith.constant 0 : i32
    %c0_i32_0 = arith.constant 0 : i32
    %c0_i32_1 = arith.constant 0 : i32
    return %c0_i32, %c0_i32_0 : i32, i32
  }
  func.func @transform_2(%arg0: i32) -> (i32, i32) {
    %c0_i32 = arith.constant 0 : i32
    %c0_i32_0 = arith.constant 0 : i32
    %c0_i32_1 = arith.constant 0 : i32
    return %c0_i32, %c0_i32_0 : i32, i32
  }
  func.func @transform_3(%arg0: i32) -> (i32, i32) {
    %c0_i32 = arith.constant 0 : i32
    %c0_i32_0 = arith.constant 0 : i32
    %c0_i32_1 = arith.constant 0 : i32
    return %c0_i32, %c0_i32_0 : i32, i32
  }
  func.func @transform_4(%arg0: i32) -> (i32, i32) {
    %c0_i32 = arith.constant 0 : i32
    %c0_i32_0 = arith.constant 0 : i32
    %c0_i32_1 = arith.constant 0 : i32
    return %c0_i32, %c0_i32_0 : i32, i32
  }
  func.func @transform_5(%arg0: i32) -> (i32, i32) {
    %c0_i32 = arith.constant 0 : i32
    %c0_i32_0 = arith.constant 0 : i32
    %c0_i32_1 = arith.constant 0 : i32
    return %c0_i32, %c0_i32_0 : i32, i32
  }
  func.func @transform_6(%arg0: i32) -> (i32, i32) {
    %c0_i32 = arith.constant 0 : i32
    %c0_i32_0 = arith.constant 0 : i32
    %c0_i32_1 = arith.constant 0 : i32
    return %c0_i32, %c0_i32_0 : i32, i32
  }
  func.func @transform_7(%arg0: i32) -> (i32, i32) {
    %c0_i32 = arith.constant 0 : i32
    %c0_i32_0 = arith.constant 0 : i32
    %c0_i32_1 = arith.constant 0 : i32
    return %c0_i32, %c0_i32_0 : i32, i32
  }
  func.func @transform_8(%arg0: i32) -> (i32, i32) {
    %c0_i32 = arith.constant 0 : i32
    %c0_i32_0 = arith.constant 0 : i32
    %c0_i32_1 = arith.constant 0 : i32
    return %c0_i32, %c0_i32_0 : i32, i32
  }
}

</mosaic_0001>

<bundles_post_ra>
// kernel: tpu_custom_call.1
= control target key start
LH: loop header
LB: loop body
LE: loop exit
PB: predicated region body
PF: predicated region fallthrough
CT: control target
= control target key end

     0   :  { %13 = vsyncpa [#allocation3], 0  ;;  %s824_s0 = inlined_call_operand.hbm [shape: bf16[24,24], index: 0, kind: input, shape index: {}]   ;;  %s825_s1 = inlined_call_operand.vmem [shape: bf16[24,9], index: 1, kind: input, shape index: {}]   ;;  %s826_s2 = inlined_call_operand.vmem [shape: bf16[9,32], index: 2, kind: input, shape index: {}]   ;;  %s827_s3 = inlined_call_operand.vmem [shape: f32[1,32], index: 3, kind: input, shape index: {}]   ;;  %s828_s4 = inlined_call_operand.vmem [shape: bf16[32,32], index: 4, kind: input, shape index: {}]   ;;  %s829_s5 = inlined_call_operand.vmem [shape: f32[1,32], index: 5, kind: input, shape index: {}]   ;;  %s830_s6 = inlined_call_operand.hbm [shape: bf16[32,32], index: 6, kind: input, shape index: {}]   ;;  %s831_s7 = inlined_call_operand.vmem [shape: f32[1,32], index: 7, kind: input, shape index: {}]   ;;  %s832_s8 = inlined_call_operand.hbm [shape: bf16[24,32], index: 8, kind: output, shape index: {}]  }
   0x1   :  { %14 = vsyncpa [#allocation6], 0 }
   0x2   :  { %15 = vsyncpa [#allocation4], 0  ;;  %s709_s27 = smov [#allocation2]  }
   0x3   :  { %s21_s28 = sshll.u32 %s709_s27, 4  ;;  %s22_s28 = int_to_ptr.vmem [resolvable:$true] %s21_s28 }
   0x4   :  { %s651_s29 = scalar_lea.vmem %s22_s28, 192  ;;  %p656_p1 = scmp.lt.s32.totalorder %s22_s28, %s22_s28 }
   0x5   :  { %p652_p0 = scmp.ne.s32.totalorder %s22_s28, %s651_s29  ;;  %p657_p2 = scmp.lt.s32.totalorder %s651_s29, %s651_s29 }
   0x7   :  { %p658_p3 = por %p657_p2, %p656_p1 }
   0x9   :  { %p659_p4 = pnand %p658_p3, %p652_p0 }
   0xb   :  { %662 = shalt.err (!%p659_p4)
}
   0xc   :  { %s710_s30 = smov 64   ;;  %s711_s9 = smov 4  }
   0xd   :  { %27 = dma.hbm_to_vmem [thread:$0]  %s824_s0, 192, %s22_s28, [#allocation3], %s710_s30, %s710_s30, %s711_s9  }
   0xe   :  { %s712_s12 = smov [#allocation5]  }
   0xf   :  { %s43_s13 = sshll.u32 %s712_s12, 4  ;;  %s44_s13 = int_to_ptr.vmem [resolvable:$true] %s43_s13 }
  0x10   :  { %s671_s14 = scalar_lea.vmem %s44_s13, 256  ;;  %p676_p6 = scmp.lt.s32.totalorder %s44_s13, %s44_s13 }
  0x11   :  { %p672_p5 = scmp.ne.s32.totalorder %s44_s13, %s671_s14  ;;  %p677_p7 = scmp.lt.s32.totalorder %s671_s14, %s671_s14 }
  0x13   :  { %p678_p8 = por %p677_p7, %p676_p6 }
  0x15   :  { %p679_p9 = pnand %p678_p8, %p672_p5 }
  0x17   :  { %682 = shalt.err (!%p679_p9)
}
  0x18   :  { %49 = dma.hbm_to_vmem [thread:$0]  %s830_s6, 256, %s44_s13, [#allocation6], %s710_s30, %s710_s30, %s711_s9  }
  0x19   :  { %703 = dma.done.wait [#allocation3], 192  }
  0x1a   :  { %704 = vsyncadd [#allocation3], 4294967104 }
  0x1b   :  { %705 = dma.done.wait [#allocation6], 256  }
  0x1c   :  { %706 = vsyncadd [#allocation6], 4294967040  ;;  %vm87_vm0 = vcmask 1043456   ;;  %vm88_vm1 = vcmask 1044480   ;;  %v713_v0 = vmov 65535   ;;  %vm80_vm2 = vcmask 72704  }
  0x1d   :  { %v89_v1 = vsel %vm87_vm0, 4294967295, %v713_v0  ;;  %v634_v3 = vld [vmem:[%s826_s2] sm:$0x1f]   ;;  %v636_v6 = vld [vmem:[%s825_s1 + $0x8] ss:$0 sps:$4 sm:$0xff]   ;;  %vm159_vm3 = vcmask 195584  }
  0x1e   :  { %v90_v2 = vsel %vm88_vm1, %v89_v1, 0  ;;  %v635_v4 = vld [vmem:[%s825_s1] sm:$0xff]   ;;  %v785_v15 = vld [vmem:[#allocation2 + $0x8] ss:$0 sps:$4 sm:$0xff]   ;;  %vm238_vm4 = vcmask 261120   ;;  %v641_v38 = vld [vmem:[#allocation5 + $0x8] sm:$0xff]  }
  0x1f   :  { %v92_v5 = vand.u32 %v634_v3, %v90_v2  ;;  %581 = vmatprep.mubr.msk.bf16.mxu0 %vm80_vm2, %v635_v4  ;;  %v637_v7 = vld [vmem:[#allocation2] sm:$0xff]   ;;  %v639_v16 = vld [vmem:[%s828_s4 + $0x8] sm:$0xff]   ;;  %vm504_vm5 = vcmask 257024   ;;  %s714_s26 = smov [#allocation7]  }
  0x20   :  { %589 = vmatprep.mubr.msk.bf16.mxu1 %vm159_vm3, %v637_v7  ;;  %v640_v17 = vld [vmem:[%s828_s4] sm:$0xff]   ;;  %v642_v39 = vld [vmem:[#allocation5] sm:$0xff]   ;;  %s513_s27 = sshll.u32 %s714_s26, 4  ;;  %s514_s27 = int_to_ptr.vmem [resolvable:$true] %s513_s27 }
  0x21   :  { %579 = vmatprep.subr.bf16.mxu0 %v92_v5  ;;  %v531_v19 = vld [vmem:[%s827_s3] ss:$0 sm:$0xff]  ;;  %p688_p11 = scmp.lt.s32.totalorder %s514_s27, %s514_s27 }
  0x22   :  { %580 = vmatpush3.bf16.msra.mxu0 %v92_v5  ;;  %v540_v41 = vld [vmem:[%s829_s5] ss:$0 sm:$0xff] }
  0x23   :  { %593 = vmatprep.subr.bf16.mxu0 %v639_v16  ;;  %v547_v60 = vld [vmem:[%s831_s7] ss:$0 sm:$0xff]  ;;  %s683_s7 = scalar_lea.vmem %s514_s27, 192 }
  0x24   :  { %p684_p10 = scmp.ne.s32.totalorder %s514_s27, %s683_s7  ;;  %p689_p12 = scmp.lt.s32.totalorder %s683_s7, %s683_s7 }
  0x25   :  { %582 = vmatmul.mubr.msk.bf16.vlgmr.msra.gmra.mxu0 %vm80_vm2, %v636_v6 }
  0x26   :  { %594 = vmatpush3.bf16.msra.mxu0 %v639_v16  ;;  %p690_p13 = por %p689_p12, %p688_p11 }
  0x27   :  { %595 = vmatprep.subr.bf16.mxu0 %v640_v17 }
  0x28   :  { %p691_p0 = pnand %p690_p13, %p684_p10 }
  0x2a   :  { %596 = vmatpush3.bf16.msra.mxu0 %v640_v17 }
  0x2b   :  { %609 = vmatprep.subr.bf16.mxu0 %v641_v38 }
  0xe5   :  { %v583_v8 = vpop.f32.mrf.mxu0 }
  0xe6   :  { %v143_v9 = vpack.c.bf16 %v583_v8, %v583_v8 }
  0xe7   :  { %v128_v10 = vpop.f32.mrf.mxu0 }
  0xe8   :  { %625 = vmatprep.subr.msk.bf16.mxu1 %vm87_vm0, %v143_v9  ;;  %v167_v11 = vsel %vm87_vm0, %v143_v9, 0 }
  0xe9   :  { %v584_v12 = vpop.f32.mrf.mxu0  ;;  %586 = vmatpush3.bf16.msra.mxu1 %v167_v11 }
  0xeb   :  { %v131_v13 = vpop.f32.mrf.mxu0 }
  0xec   :  { %v142_v14 = vpack.c.bf16 %v131_v13, %v128_v10 }
  0xee   :  { %587 = vmatprep.subr.bf16.mxu1 %v142_v14 }
  0xef   :  { %588 = vmatpush3.bf16.msra.mxu1 %v142_v14 }
  0xf2   :  { %590 = vmatmul.mubr.msk.bf16.vlgmr.msra.gmra.mxu1 %vm159_vm3, %v785_v15 }
  0xf3   :  { %605 = vmatprep.mubr.msk.bf16.mxu1 %vm159_vm3, %v637_v7 }
 0x1b2   :  { %v591_v18 = vpop.f32.mrf.mxu1 }
 0x1b3   :  { %v212_v21 = vadd.f32 %v591_v18, %v531_v19 }
 0x1b4   :  { %v203_v20 = vpop.f32.mrf.mxu1 }
 0x1b5   :  { %v204_v23 = vadd.f32 %v531_v19, %v203_v20  ;;  %v219_v26 = vmax.f32 %v212_v21, 0.0 }
 0x1b6   :  { %v592_v22 = vpop.f32.mrf.mxu1 }
 0x1b7   :  { %v217_v27 = vmax.f32 %v204_v23, 0.0  ;;  %v221_v30 = vpack.c.bf16 %v219_v26, %v219_v26 }
 0x1b8   :  { %v206_v24 = vpop.f32.mrf.mxu1 }
 0x1b9   :  { %v207_v25 = vadd.f32 %v531_v19, %v206_v24 }
 0x1bb   :  { %v218_v28 = vmax.f32 %v207_v25, 0.0 }
 0x1bd   :  { %v220_v29 = vpack.c.bf16 %v218_v28, %v217_v27 }
 0x1bf   :  { %597 = vmatprep.mubr.msk.bf16.mxu0 %vm238_vm4, %v220_v29 }
 0x1c0   :  { %598 = vmatmul.mubr.msk.bf16.vlgmr.msra.gmra.mxu0 %vm238_vm4, %v221_v30 }
 0x1c1   :  { %610 = vmatpush3.bf16.msra.mxu0 %v641_v38 }
 0x1c2   :  { %611 = vmatprep.subr.bf16.mxu0 %v642_v39 }
 0x1c5   :  { %612 = vmatpush3.bf16.msra.mxu0 %v642_v39 }
 0x280   :  { %v599_v31 = vpop.f32.mrf.mxu0 }
 0x281   :  { %v294_v32 = vpack.c.bf16 %v599_v31, %v599_v31 }
 0x282   :  { %v279_v33 = vpop.f32.mrf.mxu0 }
 0x283   :  { %v303_v34 = vsel %vm87_vm0, %v294_v32, 0  ;;  %626 = vmatprep.subr.msk.bf16.mxu1 %vm87_vm0, %v294_v32 }
 0x284   :  { %v600_v35 = vpop.f32.mrf.mxu0  ;;  %602 = vmatpush3.bf16.msra.mxu1 %v303_v34 }
 0x286   :  { %v282_v36 = vpop.f32.mrf.mxu0 }
 0x287   :  { %v293_v37 = vpack.c.bf16 %v282_v36, %v279_v33 }
 0x289   :  { %603 = vmatprep.subr.bf16.mxu1 %v293_v37 }
 0x28a   :  { %604 = vmatpush3.bf16.msra.mxu1 %v293_v37 }
 0x28d   :  { %606 = vmatmul.mubr.msk.bf16.vlgmr.msra.gmra.mxu1 %vm159_vm3, %v785_v15 }
 0x28e   :  { %621 = vmatprep.mubr.msk.bf16.mxu1 %vm159_vm3, %v637_v7 }
 0x34d   :  { %v607_v40 = vpop.f32.mrf.mxu1 }
 0x34e   :  { %v348_v43 = vadd.f32 %v607_v40, %v540_v41 }
 0x34f   :  { %v339_v42 = vpop.f32.mrf.mxu1 }
 0x350   :  { %v340_v45 = vadd.f32 %v540_v41, %v339_v42  ;;  %v355_v48 = vmax.f32 %v348_v43, 0.0 }
 0x351   :  { %v608_v44 = vpop.f32.mrf.mxu1 }
 0x352   :  { %v353_v49 = vmax.f32 %v340_v45, 0.0  ;;  %v357_v52 = vpack.c.bf16 %v355_v48, %v355_v48 }
 0x353   :  { %v342_v46 = vpop.f32.mrf.mxu1 }
 0x354   :  { %v343_v47 = vadd.f32 %v540_v41, %v342_v46 }
 0x356   :  { %v354_v50 = vmax.f32 %v343_v47, 0.0 }
 0x358   :  { %v356_v51 = vpack.c.bf16 %v354_v50, %v353_v49 }
 0x35a   :  { %613 = vmatprep.mubr.msk.bf16.mxu0 %vm238_vm4, %v356_v51 }
 0x35b   :  { %614 = vmatmul.mubr.msk.bf16.vlgmr.msra.gmra.mxu0 %vm238_vm4, %v357_v52 }
 0x41b   :  { %v615_v53 = vpop.f32.mrf.mxu0 }
 0x41c   :  { %v429_v54 = vpack.c.bf16 %v615_v53, %v615_v53 }
 0x41d   :  { %v414_v55 = vpop.f32.mrf.mxu0 }
 0x41e   :  { %v438_v56 = vsel %vm87_vm0, %v429_v54, 0  ;;  %627 = vmatprep.subr.msk.bf16.mxu1 %vm87_vm0, %v429_v54 }
 0x41f   :  { %v616_v57 = vpop.f32.mrf.mxu0  ;;  %618 = vmatpush3.bf16.msra.mxu1 %v438_v56 }
 0x421   :  { %v417_v58 = vpop.f32.mrf.mxu0 }
 0x422   :  { %v428_v59 = vpack.c.bf16 %v417_v58, %v414_v55 }
 0x424   :  { %619 = vmatprep.subr.bf16.mxu1 %v428_v59 }
 0x425   :  { %620 = vmatpush3.bf16.msra.mxu1 %v428_v59 }
 0x428   :  { %622 = vmatmul.mubr.msk.bf16.vlgmr.msra.gmra.mxu1 %vm159_vm3, %v785_v15 }
 0x4e8   :  { %v623_v61 = vpop.f32.mrf.mxu1 }
 0x4e9   :  { %v483_v62 = vadd.f32 %v623_v61, %v547_v60 }
 0x4ea   :  { %v474_v63 = vpop.f32.mrf.mxu1 }
 0x4eb   :  { %v490_v0 = vmax.f32 %v483_v62, 0.0  ;;  %v475_v1 = vadd.f32 %v547_v60, %v474_v63 }
 0x4ec   :  { %v624_v2 = vpop.f32.mrf.mxu1 }
 0x4ed   :  { %v555_v3 = vpack.c.bf16 %v490_v0, %v490_v0  ;;  %v488_v4 = vmax.f32 %v475_v1, 0.0 }
 0x4ee   :  { %v477_v5 = vpop.f32.mrf.mxu1 }
 0x4ef   :  { %v553_v6 = vpack.c.bf16 %v488_v4, %v488_v4  ;;  %v478_v7 = vadd.f32 %v547_v60, %v477_v5  ;;  %507 = vst.msk [vmem:[#allocation7 + $0x8] sm:$0xf] %vm504_vm5, %v555_v3 }
 0x4f1   :  { %v489_v8 = vmax.f32 %v478_v7, 0.0  ;;  %505 = vst.msk [vmem:[#allocation7] sm:$0xf] %vm504_vm5, %v553_v6 }
 0x4f3   :  { %v554_v9 = vpack.c.bf16 %v489_v8, %v489_v8 }
 0x4f5   :  { %506 = vst.msk [vmem:[#allocation7 + $0x4] sm:$0xf] %vm504_vm5, %v554_v9 }
 0x4f6   :  { %694 = shalt.err (!%p691_p0)
}
 0x4f7   :  { %519 = dma.vmem_to_hbm [thread:$0]  %s514_s27, 192, %s832_s8, [#allocation4], %s710_s30, %s710_s30, %s711_s9  }
 0x4f8   :  { %707 = dma.done.wait [#allocation4], 192  }
 0x4f9   :  { %708 = vsyncadd [#allocation4], 4294967104 }
 0x4fa   :  { %523 = vsyncpa [#allocation3], 1 }
 0x4fb   :  { %524 = vsyncpa [#allocation6], 1 }
 0x4fc   :  { %525 = vsyncpa [#allocation4], 1 }

</bundles_post_ra>
